<compile_context>
chip_gen: v7x
topology: tpu7x:2x2x1
jax: 0.10.0
libtpu: 0.0.40
codegen_flags: <defaults>
</compile_context>

<pallas_src>
import functools

import jax
import jax.numpy as jnp
from jax import lax
from jax.experimental import pallas as pl
from jax.experimental.pallas import tpu as pltpu
import numpy as np


def _mha_body(q_tok, k_tok, v_tok, wq_t, wk_t, wv_t, bq, bk, bv, wo_t, bo,
              *, num_heads, head_dim, need_weights):
    """Returns (attn_output (L, E) f32, averaged attn weights (L, S) f32 or None).

    The 1/sqrt(head_dim) scaling is already folded into wq_t / bq by the host.
    """
    # Fused input projections: full-E contraction depth on the MXU.
    q = jnp.dot(q_tok, wq_t, preferred_element_type=jnp.float32) + bq   # (L, E)
    k = jnp.dot(k_tok, wk_t, preferred_element_type=jnp.float32) + bk   # (S, E)
    v = jnp.dot(v_tok, wv_t, preferred_element_type=jnp.float32) + bv   # (S, E)

    ctx_cols = []
    attn_sum = None
    # Static unroll over heads: lane slices only, no in-kernel transposes.
    for h in range(num_heads):
        sl = slice(h * head_dim, (h + 1) * head_dim)
        q_h = q[:, sl]                                             # (L, hd)
        k_h = k[:, sl]                                             # (S, hd)
        v_h = v[:, sl]                                             # (S, hd)
        # q_h @ k_h^T without materializing a transpose: contract last dims.
        s_h = lax.dot_general(q_h, k_h, (((1,), (1,)), ((), ())),
                              preferred_element_type=jnp.float32)  # (L, S)
        s_h = s_h - jnp.max(s_h, axis=-1, keepdims=True)
        e_h = jnp.exp(s_h)
        p_h = e_h * pl.reciprocal(jnp.sum(e_h, axis=-1, keepdims=True),
                                  approx=True)
        ctx_cols.append(jnp.dot(p_h, v_h,
                                preferred_element_type=jnp.float32))  # (L, hd)
        if need_weights:
            attn_sum = p_h if attn_sum is None else attn_sum + p_h

    ctx = jnp.concatenate(ctx_cols, axis=-1)                          # (L, E)
    # Single output projection (full-E contraction) with bias folded in.
    out = jnp.dot(ctx, wo_t, preferred_element_type=jnp.float32) + bo  # (L, E)
    attn_avg = attn_sum * (1.0 / num_heads) if need_weights else None
    return out, attn_avg


def _mha_kernel(q_ref, k_ref, v_ref,
                wq_ref, wk_ref, wv_ref,
                bq_ref, bk_ref, bv_ref,
                wo_ref, bo_ref,
                out_ref, *attn_w_refs,
                num_heads, head_dim, need_weights):
    out, attn_avg = _mha_body(
        q_ref[0], k_ref[0], v_ref[0],
        wq_ref[...], wk_ref[...], wv_ref[...],
        bq_ref[...], bk_ref[...], bv_ref[...],
        wo_ref[...], bo_ref[...],
        num_heads=num_heads, head_dim=head_dim, need_weights=need_weights)
    out_ref[0] = out.astype(out_ref.dtype)
    if need_weights:
        attn_w_refs[0][0] = attn_avg.astype(attn_w_refs[0].dtype)


def multihead_attention(query, key, value, params, num_heads, need_weights=True):
    """query (L, N, E); key/value (S, N, E).
    Returns (attn_output (L, N, E), attn_output_weights (N, L, S) or None)."""
    L, N, E = query.shape
    S = key.shape[0]
    hd = E // num_heads
    assert hd * num_heads == E
    scaling = float(hd) ** (-0.5)

    in_w = params["in_proj_weight"].astype(jnp.float32)    # (3E, E)
    in_b = params["in_proj_bias"].astype(jnp.float32)      # (3E,)
    out_w = params["out_proj_weight"].astype(jnp.float32)  # (E, E)
    out_b = params["out_proj_bias"].astype(jnp.float32)    # (E,)

    # Pre-transposed weights (one-time host fold, no in-kernel transposes).
    # Fold the query scaling into Wq^T / bq — constants, so this is free at
    # run time and saves a per-element VPU multiply inside every grid step.
    wq_t = in_w[:E].T * scaling       # (E, E)
    wk_t = in_w[E:2 * E].T            # (E, E)
    wv_t = in_w[2 * E:].T             # (E, E)
    wo_t = out_w.T                    # (E, E)
    bq = (in_b[:E] * scaling).reshape(1, E)
    bk = in_b[E:2 * E].reshape(1, E)
    bv = in_b[2 * E:].reshape(1, E)
    bo = out_b.reshape(1, E)

    # Batch-first activation views (single cheap transpose outside the kernel).
    q_b = jnp.transpose(query, (1, 0, 2)).astype(jnp.float32)   # (N, L, E)
    k_b = jnp.transpose(key, (1, 0, 2)).astype(jnp.float32)     # (N, S, E)
    v_b = jnp.transpose(value, (1, 0, 2)).astype(jnp.float32)   # (N, S, E)

    kernel = functools.partial(_mha_kernel, num_heads=num_heads, head_dim=hd,
                               need_weights=need_weights)

    def _const2(b):
        return (0, 0)

    in_specs = [
        pl.BlockSpec((1, L, E), lambda b: (b, 0, 0)),   # query
        pl.BlockSpec((1, S, E), lambda b: (b, 0, 0)),   # key
        pl.BlockSpec((1, S, E), lambda b: (b, 0, 0)),   # value
        pl.BlockSpec((E, E), _const2),                  # Wq^T (VMEM-resident)
        pl.BlockSpec((E, E), _const2),                  # Wk^T
        pl.BlockSpec((E, E), _const2),                  # Wv^T
        pl.BlockSpec((1, E), _const2),                  # bq (pre-scaled)
        pl.BlockSpec((1, E), _const2),                  # bk
        pl.BlockSpec((1, E), _const2),                  # bv
        pl.BlockSpec((E, E), _const2),                  # Wo^T
        pl.BlockSpec((1, E), _const2),                  # out bias
    ]

    out_shape = [jax.ShapeDtypeStruct((N, L, E), jnp.float32)]
    out_specs = [pl.BlockSpec((1, L, E), lambda b: (b, 0, 0))]
    if need_weights:
        out_shape.append(jax.ShapeDtypeStruct((N, L, S), jnp.float32))
        out_specs.append(pl.BlockSpec((1, L, S), lambda b: (b, 0, 0)))

    results = pl.pallas_call(
        kernel,
        out_shape=tuple(out_shape),
        grid_spec=pltpu.PrefetchScalarGridSpec(
            num_scalar_prefetch=0,
            grid=(N,),
            in_specs=in_specs,
            out_specs=out_specs,
        ),
        compiler_params=pltpu.CompilerParams(
            dimension_semantics=("parallel",),
            vmem_limit_bytes=32 * 1024 * 1024),
    )(q_b, k_b, v_b, wq_t, wk_t, wv_t, bq, bk, bv, wo_t, bo)

    attn_output = jnp.transpose(results[0], (1, 0, 2))   # (L, N, E)
    attn_w = results[1] if need_weights else None
    return attn_output, attn_w


def reference_mha(query, key, value, params, num_heads):
    """Pure-JAX port of torch multi_head_attention_forward (no masks/dropout)."""
    L, N, E = query.shape
    S = key.shape[0]
    hd = E // num_heads
    scaling = float(hd) ** (-0.5)
    in_w = params["in_proj_weight"]
    in_b = params["in_proj_bias"]
    out_w = params["out_proj_weight"]
    out_b = params["out_proj_bias"]

    q = query @ in_w[:E].T + in_b[:E]
    k = key @ in_w[E:2 * E].T + in_b[E:2 * E]
    v = value @ in_w[2 * E:].T + in_b[2 * E:]
    q = q * scaling

    q = q.reshape(L, N * num_heads, hd).transpose(1, 0, 2)
    k = k.reshape(S, N * num_heads, hd).transpose(1, 0, 2)
    v = v.reshape(S, N * num_heads, hd).transpose(1, 0, 2)

    w = jnp.einsum("bld,bsd->bls", q, k)
    w = jax.nn.softmax(w, axis=-1)
    o = jnp.einsum("bls,bsd->bld", w, v)                 # (N*H, L, hd)
    o = o.transpose(1, 0, 2).reshape(L, N, E)
    o = o @ out_w.T + out_b
    w_avg = w.reshape(N, num_heads, L, S).sum(axis=1) / num_heads
    return o, w_avg


def _xavier_uniform(key, shape):
    fan_out, fan_in = shape[0], shape[1]
    bound = float(np.sqrt(6.0 / (fan_in + fan_out)))
    return jax.random.uniform(key, shape, jnp.float32, -bound, bound)


if __name__ == "__main__":
    # Small config: L=8 queries, S=8 keys, batch=2, embed_dim=32, 4 heads.
    L, S, N, E, H = 8, 8, 2, 32, 4

    root = jax.random.PRNGKey(0)
    k_q, k_k, k_v, k_w, k_o = jax.random.split(root, 5)

    query = jax.random.normal(k_q, (L, N, E), jnp.float32)
    key = jax.random.normal(k_k, (S, N, E), jnp.float32)
    value = jax.random.normal(k_v, (S, N, E), jnp.float32)

    params = {
        # matches MultiheadAttention._reset_parameters: xavier_uniform in_proj,
        # zero in_proj_bias / out_proj bias; out_proj weight random.
        "in_proj_weight": _xavier_uniform(k_w, (3 * E, E)),
        "in_proj_bias": jnp.zeros((3 * E,), jnp.float32),
        "out_proj_weight": _xavier_uniform(k_o, (E, E)),
        "out_proj_bias": jnp.zeros((E,), jnp.float32),
    }

    attn_out, attn_w = multihead_attention(query, key, value, params, H)
    jax.block_until_ready(attn_out)
    jax.block_until_ready(attn_w)

    ref_out, ref_w = reference_mha(query, key, value, params, H)
    # Tolerance relaxed vs. exact f32 reference because the softmax denominator
    # uses the EUP approximate reciprocal (pl.reciprocal(approx=True)).
    np.testing.assert_allclose(np.asarray(attn_out), np.asarray(ref_out),
                               rtol=5e-3, atol=5e-3)
    np.testing.assert_allclose(np.asarray(attn_w), np.asarray(ref_w),
                               rtol=5e-3, atol=5e-3)

    assert attn_out.shape == (L, N, E)
    assert attn_w.shape == (N, L, S)

    # Exercise the need_weights=False fast path (no attn-weights output,
    # no weight accumulation traced).
    attn_out_nw, attn_w_none = multihead_attention(query, key, value, params, H,
                                                   need_weights=False)
    jax.block_until_ready(attn_out_nw)
    assert attn_w_none is None
    np.testing.assert_allclose(np.asarray(attn_out_nw), np.asarray(ref_out),
                               rtol=5e-3, atol=5e-3)

    print("KERNEL_OK")
</pallas_src>

<mosaic_0001>
module attributes {stable_mosaic.version = 11 : i64} {
  func.func @_mha_kernel(%arg0: i32, %arg1: memref<1x8x32xf32, #tpu.memory_space<vmem>>, %arg2: memref<1x8x32xf32, #tpu.memory_space<vmem>>, %arg3: memref<1x8x32xf32, #tpu.memory_space<vmem>>, %arg4: memref<32x32xf32, #tpu.memory_space<vmem>>, %arg5: memref<32x32xf32, #tpu.memory_space<vmem>>, %arg6: memref<32x32xf32, #tpu.memory_space<vmem>>, %arg7: memref<1x32xf32, #tpu.memory_space<vmem>>, %arg8: memref<1x32xf32, #tpu.memory_space<vmem>>, %arg9: memref<1x32xf32, #tpu.memory_space<vmem>>, %arg10: memref<32x32xf32, #tpu.memory_space<vmem>>, %arg11: memref<1x32xf32, #tpu.memory_space<vmem>>, %arg12: memref<1x8x32xf32, #tpu.memory_space<vmem>>, %arg13: memref<1x8x8xf32, #tpu.memory_space<vmem>>) attributes {dimension_semantics = [#tpu.dimension_semantics<parallel>], iteration_bounds = array<i64: 2>, scalar_prefetch = 0 : i64, scratch_operands = 0 : i64, tpu.core_type = #tpu.core_type<tc>, window_params = [{transform_indices = @transform_0, window_bounds = array<i64: 1, 8, 32>}, {transform_indices = @transform_1, window_bounds = array<i64: 1, 8, 32>}, {transform_indices = @transform_2, window_bounds = array<i64: 1, 8, 32>}, {pipeline_mode = #tpu.pipeline_mode<synchronous>, transform_indices = @transform_3, window_bounds = array<i64: 32, 32>}, {pipeline_mode = #tpu.pipeline_mode<synchronous>, transform_indices = @transform_4, window_bounds = array<i64: 32, 32>}, {pipeline_mode = #tpu.pipeline_mode<synchronous>, transform_indices = @transform_5, window_bounds = array<i64: 32, 32>}, {pipeline_mode = #tpu.pipeline_mode<synchronous>, transform_indices = @transform_6, window_bounds = array<i64: 1, 32>}, {pipeline_mode = #tpu.pipeline_mode<synchronous>, transform_indices = @transform_7, window_bounds = array<i64: 1, 32>}, {pipeline_mode = #tpu.pipeline_mode<synchronous>, transform_indices = @transform_8, window_bounds = array<i64: 1, 32>}, {pipeline_mode = #tpu.pipeline_mode<synchronous>, transform_indices = @transform_9, window_bounds = array<i64: 32, 32>}, {pipeline_mode = #tpu.pipeline_mode<synchronous>, transform_indices = @transform_10, window_bounds = array<i64: 1, 32>}, {transform_indices = @transform_11, window_bounds = array<i64: 1, 8, 32>}, {transform_indices = @transform_12, window_bounds = array<i64: 1, 8, 8>}]} {
    %c0 = arith.constant 0 : index
    %c0_0 = arith.constant 0 : index
    %c0_1 = arith.constant 0 : index
    %0 = vector.load %arg1[%c0, %c0_0, %c0_1] : memref<1x8x32xf32, #tpu.memory_space<vmem>>, vector<1x8x32xf32>
    %1 = vector.shape_cast %0 : vector<1x8x32xf32> to vector<8x32xf32>
    %c0_2 = arith.constant 0 : index
    %c0_3 = arith.constant 0 : index
    %c0_4 = arith.constant 0 : index
    %2 = vector.load %arg2[%c0_2, %c0_3, %c0_4] : memref<1x8x32xf32, #tpu.memory_space<vmem>>, vector<1x8x32xf32>
    %3 = vector.shape_cast %2 : vector<1x8x32xf32> to vector<8x32xf32>
    %c0_5 = arith.constant 0 : index
    %c0_6 = arith.constant 0 : index
    %c0_7 = arith.constant 0 : index
    %4 = vector.load %arg3[%c0_5, %c0_6, %c0_7] : memref<1x8x32xf32, #tpu.memory_space<vmem>>, vector<1x8x32xf32>
    %5 = vector.shape_cast %4 : vector<1x8x32xf32> to vector<8x32xf32>
    %c0_8 = arith.constant 0 : index
    %c0_9 = arith.constant 0 : index
    %6 = vector.load %arg4[%c0_8, %c0_9] : memref<32x32xf32, #tpu.memory_space<vmem>>, vector<32x32xf32>
    %c0_10 = arith.constant 0 : index
    %c0_11 = arith.constant 0 : index
    %7 = vector.load %arg5[%c0_10, %c0_11] : memref<32x32xf32, #tpu.memory_space<vmem>>, vector<32x32xf32>
    %c0_12 = arith.constant 0 : index
    %c0_13 = arith.constant 0 : index
    %8 = vector.load %arg6[%c0_12, %c0_13] : memref<32x32xf32, #tpu.memory_space<vmem>>, vector<32x32xf32>
    %c0_14 = arith.constant 0 : index
    %c0_15 = arith.constant 0 : index
    %9 = vector.load %arg7[%c0_14, %c0_15] : memref<1x32xf32, #tpu.memory_space<vmem>>, vector<1x32xf32>
    %c0_16 = arith.constant 0 : index
    %c0_17 = arith.constant 0 : index
    %10 = vector.load %arg8[%c0_16, %c0_17] : memref<1x32xf32, #tpu.memory_space<vmem>>, vector<1x32xf32>
    %c0_18 = arith.constant 0 : index
    %c0_19 = arith.constant 0 : index
    %11 = vector.load %arg9[%c0_18, %c0_19] : memref<1x32xf32, #tpu.memory_space<vmem>>, vector<1x32xf32>
    %c0_20 = arith.constant 0 : index
    %c0_21 = arith.constant 0 : index
    %12 = vector.load %arg10[%c0_20, %c0_21] : memref<32x32xf32, #tpu.memory_space<vmem>>, vector<32x32xf32>
    %c0_22 = arith.constant 0 : index
    %c0_23 = arith.constant 0 : index
    %13 = vector.load %arg11[%c0_22, %c0_23] : memref<1x32xf32, #tpu.memory_space<vmem>>, vector<1x32xf32>
    %cst = arith.constant dense<0.000000e+00> : vector<8x32xf32>
    %14 = tpu.matmul %1, %6, %cst {dimension_numbers = #tpu.dot_dimension_numbers<[1], [0], [0], [1], [0, 0, 1, 1], [], []>} : vector<8x32xf32>, vector<32x32xf32>, vector<8x32xf32> -> vector<8x32xf32>
    %15 = vector.broadcast %9 : vector<1x32xf32> to vector<8x32xf32>
    %16 = arith.addf %14, %15 : vector<8x32xf32>
    %cst_24 = arith.constant dense<0.000000e+00> : vector<8x32xf32>
    %17 = tpu.matmul %3, %7, %cst_24 {dimension_numbers = #tpu.dot_dimension_numbers<[1], [0], [0], [1], [0, 0, 1, 1], [], []>} : vector<8x32xf32>, vector<32x32xf32>, vector<8x32xf32> -> vector<8x32xf32>
    %18 = vector.broadcast %10 : vector<1x32xf32> to vector<8x32xf32>
    %19 = arith.addf %17, %18 : vector<8x32xf32>
    %cst_25 = arith.constant dense<0.000000e+00> : vector<8x32xf32>
    %20 = tpu.matmul %5, %8, %cst_25 {dimension_numbers = #tpu.dot_dimension_numbers<[1], [0], [0], [1], [0, 0, 1, 1], [], []>} : vector<8x32xf32>, vector<32x32xf32>, vector<8x32xf32> -> vector<8x32xf32>
    %21 = vector.broadcast %11 : vector<1x32xf32> to vector<8x32xf32>
    %22 = arith.addf %20, %21 : vector<8x32xf32>
    %23 = vector.extract_strided_slice %16 {offsets = [0, 0], sizes = [8, 8], strides = [1, 1]} : vector<8x32xf32> to vector<8x8xf32>
    %24 = vector.extract_strided_slice %19 {offsets = [0, 0], sizes = [8, 8], strides = [1, 1]} : vector<8x32xf32> to vector<8x8xf32>
    %25 = vector.extract_strided_slice %22 {offsets = [0, 0], sizes = [8, 8], strides = [1, 1]} : vector<8x32xf32> to vector<8x8xf32>
    %cst_26 = arith.constant dense<0.000000e+00> : vector<8x8xf32>
    %26 = tpu.matmul %23, %24, %cst_26 {dimension_numbers = #tpu.dot_dimension_numbers<[1], [1], [0], [0], [0, 0, 1, 0], [], []>} : vector<8x8xf32>, vector<8x8xf32>, vector<8x8xf32> -> vector<8x8xf32>
    %cst_27 = arith.constant dense<0xFF800000> : vector<8xf32>
    %27 = vector.multi_reduction <maximumf>, %26, %cst_27 [1] : vector<8x8xf32> to vector<8xf32>
    %28 = vector.shape_cast %27 : vector<8xf32> to vector<8x1xf32>
    %29 = vector.broadcast %28 : vector<8x1xf32> to vector<8x8xf32>
    %30 = arith.subf %26, %29 : vector<8x8xf32>
    %31 = math.exp %30 : vector<8x8xf32>
    %cst_28 = arith.constant dense<0.000000e+00> : vector<8xf32>
    %32 = vector.multi_reduction <add>, %31, %cst_28 [1] : vector<8x8xf32> to vector<8xf32>
    %33 = vector.shape_cast %32 : vector<8xf32> to vector<8x1xf32>
    %34 = tpu.reciprocal %33 {approx = true} : vector<8x1xf32> -> vector<8x1xf32>
    %35 = vector.broadcast %34 : vector<8x1xf32> to vector<8x8xf32>
    %36 = arith.mulf %31, %35 : vector<8x8xf32>
    %cst_29 = arith.constant dense<0.000000e+00> : vector<8x8xf32>
    %37 = tpu.matmul %36, %25, %cst_29 {dimension_numbers = #tpu.dot_dimension_numbers<[1], [0], [0], [1], [0, 0, 1, 1], [], []>} : vector<8x8xf32>, vector<8x8xf32>, vector<8x8xf32> -> vector<8x8xf32>
    %38 = vector.extract_strided_slice %16 {offsets = [0, 8], sizes = [8, 8], strides = [1, 1]} : vector<8x32xf32> to vector<8x8xf32>
    %39 = vector.extract_strided_slice %19 {offsets = [0, 8], sizes = [8, 8], strides = [1, 1]} : vector<8x32xf32> to vector<8x8xf32>
    %40 = vector.extract_strided_slice %22 {offsets = [0, 8], sizes = [8, 8], strides = [1, 1]} : vector<8x32xf32> to vector<8x8xf32>
    %cst_30 = arith.constant dense<0.000000e+00> : vector<8x8xf32>
    %41 = tpu.matmul %38, %39, %cst_30 {dimension_numbers = #tpu.dot_dimension_numbers<[1], [1], [0], [0], [0, 0, 1, 0], [], []>} : vector<8x8xf32>, vector<8x8xf32>, vector<8x8xf32> -> vector<8x8xf32>
    %cst_31 = arith.constant dense<0xFF800000> : vector<8xf32>
    %42 = vector.multi_reduction <maximumf>, %41, %cst_31 [1] : vector<8x8xf32> to vector<8xf32>
    %43 = vector.shape_cast %42 : vector<8xf32> to vector<8x1xf32>
    %44 = vector.broadcast %43 : vector<8x1xf32> to vector<8x8xf32>
    %45 = arith.subf %41, %44 : vector<8x8xf32>
    %46 = math.exp %45 : vector<8x8xf32>
    %cst_32 = arith.constant dense<0.000000e+00> : vector<8xf32>
    %47 = vector.multi_reduction <add>, %46, %cst_32 [1] : vector<8x8xf32> to vector<8xf32>
    %48 = vector.shape_cast %47 : vector<8xf32> to vector<8x1xf32>
    %49 = tpu.reciprocal %48 {approx = true} : vector<8x1xf32> -> vector<8x1xf32>
    %50 = vector.broadcast %49 : vector<8x1xf32> to vector<8x8xf32>
    %51 = arith.mulf %46, %50 : vector<8x8xf32>
    %cst_33 = arith.constant dense<0.000000e+00> : vector<8x8xf32>
    %52 = tpu.matmul %51, %40, %cst_33 {dimension_numbers = #tpu.dot_dimension_numbers<[1], [0], [0], [1], [0, 0, 1, 1], [], []>} : vector<8x8xf32>, vector<8x8xf32>, vector<8x8xf32> -> vector<8x8xf32>
    %53 = arith.addf %36, %51 : vector<8x8xf32>
    %54 = vector.extract_strided_slice %16 {offsets = [0, 16], sizes = [8, 8], strides = [1, 1]} : vector<8x32xf32> to vector<8x8xf32>
    %55 = vector.extract_strided_slice %19 {offsets = [0, 16], sizes = [8, 8], strides = [1, 1]} : vector<8x32xf32> to vector<8x8xf32>
    %56 = vector.extract_strided_slice %22 {offsets = [0, 16], sizes = [8, 8], strides = [1, 1]} : vector<8x32xf32> to vector<8x8xf32>
    %cst_34 = arith.constant dense<0.000000e+00> : vector<8x8xf32>
    %57 = tpu.matmul %54, %55, %cst_34 {dimension_numbers = #tpu.dot_dimension_numbers<[1], [1], [0], [0], [0, 0, 1, 0], [], []>} : vector<8x8xf32>, vector<8x8xf32>, vector<8x8xf32> -> vector<8x8xf32>
    %cst_35 = arith.constant dense<0xFF800000> : vector<8xf32>
    %58 = vector.multi_reduction <maximumf>, %57, %cst_35 [1] : vector<8x8xf32> to vector<8xf32>
    %59 = vector.shape_cast %58 : vector<8xf32> to vector<8x1xf32>
    %60 = vector.broadcast %59 : vector<8x1xf32> to vector<8x8xf32>
    %61 = arith.subf %57, %60 : vector<8x8xf32>
    %62 = math.exp %61 : vector<8x8xf32>
    %cst_36 = arith.constant dense<0.000000e+00> : vector<8xf32>
    %63 = vector.multi_reduction <add>, %62, %cst_36 [1] : vector<8x8xf32> to vector<8xf32>
    %64 = vector.shape_cast %63 : vector<8xf32> to vector<8x1xf32>
    %65 = tpu.reciprocal %64 {approx = true} : vector<8x1xf32> -> vector<8x1xf32>
    %66 = vector.broadcast %65 : vector<8x1xf32> to vector<8x8xf32>
    %67 = arith.mulf %62, %66 : vector<8x8xf32>
    %cst_37 = arith.constant dense<0.000000e+00> : vector<8x8xf32>
    %68 = tpu.matmul %67, %56, %cst_37 {dimension_numbers = #tpu.dot_dimension_numbers<[1], [0], [0], [1], [0, 0, 1, 1], [], []>} : vector<8x8xf32>, vector<8x8xf32>, vector<8x8xf32> -> vector<8x8xf32>
    %69 = arith.addf %53, %67 : vector<8x8xf32>
    %70 = vector.extract_strided_slice %16 {offsets = [0, 24], sizes = [8, 8], strides = [1, 1]} : vector<8x32xf32> to vector<8x8xf32>
    %71 = vector.extract_strided_slice %19 {offsets = [0, 24], sizes = [8, 8], strides = [1, 1]} : vector<8x32xf32> to vector<8x8xf32>
    %72 = vector.extract_strided_slice %22 {offsets = [0, 24], sizes = [8, 8], strides = [1, 1]} : vector<8x32xf32> to vector<8x8xf32>
    %cst_38 = arith.constant dense<0.000000e+00> : vector<8x8xf32>
    %73 = tpu.matmul %70, %71, %cst_38 {dimension_numbers = #tpu.dot_dimension_numbers<[1], [1], [0], [0], [0, 0, 1, 0], [], []>} : vector<8x8xf32>, vector<8x8xf32>, vector<8x8xf32> -> vector<8x8xf32>
    %cst_39 = arith.constant dense<0xFF800000> : vector<8xf32>
    %74 = vector.multi_reduction <maximumf>, %73, %cst_39 [1] : vector<8x8xf32> to vector<8xf32>
    %75 = vector.shape_cast %74 : vector<8xf32> to vector<8x1xf32>
    %76 = vector.broadcast %75 : vector<8x1xf32> to vector<8x8xf32>
    %77 = arith.subf %73, %76 : vector<8x8xf32>
    %78 = math.exp %77 : vector<8x8xf32>
    %cst_40 = arith.constant dense<0.000000e+00> : vector<8xf32>
    %79 = vector.multi_reduction <add>, %78, %cst_40 [1] : vector<8x8xf32> to vector<8xf32>
    %80 = vector.shape_cast %79 : vector<8xf32> to vector<8x1xf32>
    %81 = tpu.reciprocal %80 {approx = true} : vector<8x1xf32> -> vector<8x1xf32>
    %82 = vector.broadcast %81 : vector<8x1xf32> to vector<8x8xf32>
    %83 = arith.mulf %78, %82 : vector<8x8xf32>
    %cst_41 = arith.constant dense<0.000000e+00> : vector<8x8xf32>
    %84 = tpu.matmul %83, %72, %cst_41 {dimension_numbers = #tpu.dot_dimension_numbers<[1], [0], [0], [1], [0, 0, 1, 1], [], []>} : vector<8x8xf32>, vector<8x8xf32>, vector<8x8xf32> -> vector<8x8xf32>
    %85 = arith.addf %69, %83 : vector<8x8xf32>
    %86 = tpu.concatenate %37, %52, %68, %84 in 1 : vector<8x8xf32>, vector<8x8xf32>, vector<8x8xf32>, vector<8x8xf32> -> vector<8x32xf32>
    %cst_42 = arith.constant dense<0.000000e+00> : vector<8x32xf32>
    %87 = tpu.matmul %86, %12, %cst_42 {dimension_numbers = #tpu.dot_dimension_numbers<[1], [0], [0], [1], [0, 0, 1, 1], [], []>} : vector<8x32xf32>, vector<32x32xf32>, vector<8x32xf32> -> vector<8x32xf32>
    %88 = vector.broadcast %13 : vector<1x32xf32> to vector<8x32xf32>
    %89 = arith.addf %87, %88 : vector<8x32xf32>
    %cst_43 = arith.constant 2.500000e-01 : f32
    %90 = vector.broadcast %cst_43 : f32 to vector<8x8xf32>
    %91 = arith.mulf %85, %90 : vector<8x8xf32>
    %c0_44 = arith.constant 0 : index
    %c0_45 = arith.constant 0 : index
    %c0_46 = arith.constant 0 : index
    %92 = vector.load %arg12[%c0_44, %c0_45, %c0_46] : memref<1x8x32xf32, #tpu.memory_space<vmem>>, vector<1x8x32xf32>
    %93 = vector.shape_cast %92 : vector<1x8x32xf32> to vector<8x32xf32>
    %94 = vector.shape_cast %89 : vector<8x32xf32> to vector<1x8x32xf32>
    tpu.vector_store %arg12[%c0_44, %c0_45, %c0_46], %94 {strides = array<i32>} : memref<1x8x32xf32, #tpu.memory_space<vmem>>, vector<1x8x32xf32>,
    %c0_47 = arith.constant 0 : index
    %c0_48 = arith.constant 0 : index
    %c0_49 = arith.constant 0 : index
    %95 = vector.load %arg13[%c0_47, %c0_48, %c0_49] : memref<1x8x8xf32, #tpu.memory_space<vmem>>, vector<1x8x8xf32>
    %96 = vector.shape_cast %95 : vector<1x8x8xf32> to vector<8x8xf32>
    %97 = vector.shape_cast %91 : vector<8x8xf32> to vector<1x8x8xf32>
    tpu.vector_store %arg13[%c0_47, %c0_48, %c0_49], %97 {strides = array<i32>} : memref<1x8x8xf32, #tpu.memory_space<vmem>>, vector<1x8x8xf32>,
    return
  }
  func.func @transform_0(%arg0: i32) -> (i32, i32, i32) {
    %c0_i32 = arith.constant 0 : i32
    %c0_i32_0 = arith.constant 0 : i32
    %c0_i32_1 = arith.constant 0 : i32
    return %arg0, %c0_i32, %c0_i32_0 : i32, i32, i32
  }
  func.func @transform_1(%arg0: i32) -> (i32, i32, i32) {
    %c0_i32 = arith.constant 0 : i32
    %c0_i32_0 = arith.constant 0 : i32
    %c0_i32_1 = arith.constant 0 : i32
    return %arg0, %c0_i32, %c0_i32_0 : i32, i32, i32
  }
  func.func @transform_2(%arg0: i32) -> (i32, i32, i32) {
    %c0_i32 = arith.constant 0 : i32
    %c0_i32_0 = arith.constant 0 : i32
    %c0_i32_1 = arith.constant 0 : i32
    return %arg0, %c0_i32, %c0_i32_0 : i32, i32, i32
  }
  func.func @transform_3(%arg0: i32) -> (i32, i32) {
    %c0_i32 = arith.constant 0 : i32
    %c0_i32_0 = arith.constant 0 : i32
    %c0_i32_1 = arith.constant 0 : i32
    return %c0_i32, %c0_i32_0 : i32, i32
  }
  func.func @transform_4(%arg0: i32) -> (i32, i32) {
    %c0_i32 = arith.constant 0 : i32
    %c0_i32_0 = arith.constant 0 : i32
    %c0_i32_1 = arith.constant 0 : i32
    return %c0_i32, %c0_i32_0 : i32, i32
  }
  func.func @transform_5(%arg0: i32) -> (i32, i32) {
    %c0_i32 = arith.constant 0 : i32
    %c0_i32_0 = arith.constant 0 : i32
    %c0_i32_1 = arith.constant 0 : i32
    return %c0_i32, %c0_i32_0 : i32, i32
  }
  func.func @transform_6(%arg0: i32) -> (i32, i32) {
    %c0_i32 = arith.constant 0 : i32
    %c0_i32_0 = arith.constant 0 : i32
    %c0_i32_1 = arith.constant 0 : i32
    return %c0_i32, %c0_i32_0 : i32, i32
  }
  func.func @transform_7(%arg0: i32) -> (i32, i32) {
    %c0_i32 = arith.constant 0 : i32
    %c0_i32_0 = arith.constant 0 : i32
    %c0_i32_1 = arith.constant 0 : i32
    return %c0_i32, %c0_i32_0 : i32, i32
  }
  func.func @transform_8(%arg0: i32) -> (i32, i32) {
    %c0_i32 = arith.constant 0 : i32
    %c0_i32_0 = arith.constant 0 : i32
    %c0_i32_1 = arith.constant 0 : i32
    return %c0_i32, %c0_i32_0 : i32, i32
  }
  func.func @transform_9(%arg0: i32) -> (i32, i32) {
    %c0_i32 = arith.constant 0 : i32
    %c0_i32_0 = arith.constant 0 : i32
    %c0_i32_1 = arith.constant 0 : i32
    return %c0_i32, %c0_i32_0 : i32, i32
  }
  func.func @transform_10(%arg0: i32) -> (i32, i32) {
    %c0_i32 = arith.constant 0 : i32
    %c0_i32_0 = arith.constant 0 : i32
    %c0_i32_1 = arith.constant 0 : i32
    return %c0_i32, %c0_i32_0 : i32, i32
  }
  func.func @transform_11(%arg0: i32) -> (i32, i32, i32) {
    %c0_i32 = arith.constant 0 : i32
    %c0_i32_0 = arith.constant 0 : i32
    %c0_i32_1 = arith.constant 0 : i32
    return %arg0, %c0_i32, %c0_i32_0 : i32, i32, i32
  }
  func.func @transform_12(%arg0: i32) -> (i32, i32, i32) {
    %c0_i32 = arith.constant 0 : i32
    %c0_i32_0 = arith.constant 0 : i32
    %c0_i32_1 = arith.constant 0 : i32
    return %arg0, %c0_i32, %c0_i32_0 : i32, i32, i32
  }
}

</mosaic_0001>

<bundles_post_ra>
// kernel: tpu_custom_call.1
= control target key start
LH: loop header
LB: loop body
LE: loop exit
PB: predicated region body
PF: predicated region fallthrough
CT: control target
= control target key end

     0   :  { %s3022_s0 = inlined_call_operand.hbm [shape: f32[2,8,32], index: 0, kind: input, shape index: {}]   ;;  %s3023_s1 = inlined_call_operand.hbm [shape: f32[2,8,32], index: 1, kind: input, shape index: {}]   ;;  %s3024_s2 = inlined_call_operand.hbm [shape: f32[2,8,32], index: 2, kind: input, shape index: {}]   ;;  %s3025_s3 = inlined_call_operand.hbm [shape: f32[32,32], index: 3, kind: input, shape index: {}]   ;;  %s3026_s4 = inlined_call_operand.hbm [shape: f32[32,32], index: 4, kind: input, shape index: {}]   ;;  %s3027_s5 = inlined_call_operand.hbm [shape: f32[32,32], index: 5, kind: input, shape index: {}]   ;;  %s3028_s6 = inlined_call_operand.vmem [shape: f32[1,32], index: 6, kind: input, shape index: {}]   ;;  %s3029_s7 = inlined_call_operand.vmem [shape: f32[1,32], index: 7, kind: input, shape index: {}]   ;;  %s3030_s8 = inlined_call_operand.hbm [shape: f32[1,32], index: 8, kind: input, shape index: {}]   ;;  %s3031_s9 = inlined_call_operand.vmem [shape: f32[32,32], index: 9, kind: input, shape index: {}]   ;;  %s3032_s10 = inlined_call_operand.vmem [shape: f32[1,32], index: 10, kind: input, shape index: {}]   ;;  %s3033_s11 = inlined_call_operand.hbm [shape: f32[2,8,32], index: 11, kind: output, shape index: {0}]   ;;  %s3034_s12 = inlined_call_operand.hbm [shape: f32[2,8,8], index: 12, kind: output, shape index: {1}]  }
   0x1   :  { %3060 = sst [smem:[#allocation29_spill]] %s3023_s1 }
   0x2   :  { %3061 = sst [smem:[#allocation30_spill]] %s3025_s3 }
   0x3   :  { %3062 = sst [smem:[#allocation31_spill]] %s3027_s5 }
   0x4   :  { %3063 = sst [smem:[#allocation32_spill]] %s3028_s6 }
   0x5   :  { %3064 = sst [smem:[#allocation33_spill]] %s3031_s9 }
   0x6   :  { %3065 = sst [smem:[#allocation34_spill]] %s3032_s10 }
   0x7   :  { %3066 = sst [smem:[#allocation35_spill]] %s3033_s11 }
   0x8   :  { %3067 = sst [smem:[#allocation36_spill]] %s3034_s12 }
   0x9   :  { %18 = vsyncpa [#allocation3], 0 }
   0xa   :  { %20 = vsyncpa [#allocation3 + $0x1], 0 }
   0xb   :  { %21 = vsyncpa [#allocation6], 0 }
   0xc   :  { %23 = vsyncpa [#allocation6 + $0x1], 0 }
   0xd   :  { %24 = vsyncpa [#allocation9], 0 }
   0xe   :  { %25 = vsyncpa [#allocation12], 0 }
   0xf   :  { %26 = vsyncpa [#allocation4], 0 }
  0x10   :  { %28 = vsyncpa [#allocation4 + $0x1], 0 }
  0x11   :  { %29 = vsyncpa [#allocation16], 0 }
  0x12   :  { %31 = vsyncpa [#allocation16 + $0x1], 0  ;;  %s2523_s21 = smov 0   ;;  %s2525_s22 = smov 0  }
  0x13   :  { %s2527_s23 = smov 0   ;;  %s2529_s24 = smov 0  }
  0x14 LB: > { %3068 = sst [smem:[#allocation23_spill]] %s2424_s21  ;;  %s2438_s25 = smov [#allocation8]   ;;  %s2436_s24 = sphi %s2529_s24, %s3111_s24   ;;  %s2432_s23 = sphi %s2527_s23, %s3115_s23   ;;  %s2428_s22 = sphi %s2525_s22, %s3114_s22   ;;  %s2424_s21 = sphi %s2523_s21, %s3113_s21  }
  0x15   : > { %3069 = sst [smem:[#allocation24_spill]] %s2436_s24  ;;  %s352_s26 = sshll.u32 %s2438_s25, 4  ;;  %s2549_s26 = int_to_ptr.vmem [resolvable:$true] %s352_s26 }
  0x16   : > { %s2544_s27 = sadd.s32 4294967295, %s2436_s24   ;;  %p1803_p0 = scmp.ge.s32.totalorder %s2436_s24, 1 }
  0x17   : > { %p3046_p1 = scmp.eq.s32.totalorder %s2544_s27, 0  ;;  %p340_p2 = scmp.lt.s32.totalorder %s2436_s24, 3 }
  0x18   : > { %s2439_s29 = smov [#allocation11]   ;;  %s3072_s3 = sld [smem:[#allocation30_spill]] }
  0x19   : > { %p2551_p3 = pnand %p1803_p0, %p340_p2  ;;  %s378_s30 = sshll.u32 %s2439_s29, 4  ;;  %s2564_s30 = int_to_ptr.vmem [resolvable:$true] %s378_s30 }
  0x1b   : > { %s3070_s28 = scalar_select %p2551_p3, 1, 0 }
  0x1c   : > { %p2021_p5 = pneg %p2551_p3 }
  0x1e   : > { %p2560_p6 = pnand %p2021_p5, %p3046_p1  ;;  %s2124_s16 = scalar_lea.hbm %s3072_s3, 512 }
  0x1f   : > { %p2125_p7 = scmp.ne.s32.totalorder %s3072_s3, %s2124_s16  ;;  %p2131_p11 = scmp.lt.u32.totalorder %s2124_s16, %s3072_s3 }
  0x20   : > { %s3071_s13 = scalar_select %p2560_p6, 1, 0 }
  0x21   : > { %p2574_p8 = pneg %p2560_p6 }
  0x23   : > { %s3073_s19 = scalar_select %p2574_p8, 1, 0 }
  0x24   : > { %p2127_p9 = pnand %p2574_p8, %p2125_p7 }
  0x26   : > { %p2128_p10 = pneg %p2127_p9 }
  0x28   : > { %p2133_p12 = pnand %p2131_p11, %p2128_p10 }
  0x2a   : > { %2136 = shalt.err (!%p2133_p12)
}
  0x2b   : > { %s2137_s29 = scalar_lea.vmem %s2549_s26, 512  ;;  %p2145_p5 = scmp.lt.s32.totalorder %s2549_s26, %s2549_s26 }
  0x2c   : > { %p2138_p13 = scmp.ne.s32.totalorder %s2549_s26, %s2137_s29  ;;  %p2146_p4 = scmp.lt.s32.totalorder %s2137_s29, %s2137_s29 }
  0x2e   : > { %p2140_p0 = pnand %p2138_p13, %p2574_p8  ;;  %p2147_p7 = por %p2146_p4, %p2145_p5 }
  0x30   : > { %p2141_p2 = pneg %p2140_p0 }
  0x32   : > { %p2148_p9 = pnand %p2147_p7, %p2141_p2 }
  0x34   : > { %2151 = shalt.err (!%p2148_p9)
}
  0x35   : > { %s3038_s14 = smov 128   ;;  %s3039_s15 = smov 8  }
  0x36   : > { %2024 = dma.hbm_to_vmem [thread:$0]  (!%p2560_p6), %s3072_s3, 512, %s2549_s26, [#allocation9], %s3038_s14, %s3038_s14, %s3039_s15  }
  0x37   : > { %s3074_s5 = sld [smem:[#allocation31_spill]] }
  0x3d   : > { %s2152_s25 = scalar_lea.hbm %s3074_s5, 512 }
  0x3e   : > { %p2153_p4 = scmp.ne.s32.totalorder %s3074_s5, %s2152_s25  ;;  %p2159_p12 = scmp.lt.u32.totalorder %s2152_s25, %s3074_s5 }
  0x40   : > { %p2155_p10 = pnand %p2153_p4, %p2574_p8 }
  0x42   : > { %p2156_p11 = pneg %p2155_p10 }
  0x44   : > { %p2161_p13 = pnand %p2159_p12, %p2156_p11 }
  0x46   : > { %2164 = shalt.err (!%p2161_p13)
}
  0x47   : > { %s2165_s26 = scalar_lea.vmem %s2564_s30, 512  ;;  %p2173_p7 = scmp.lt.s32.totalorder %s2564_s30, %s2564_s30 }
  0x48   : > { %p2166_p0 = scmp.ne.s32.totalorder %s2564_s30, %s2165_s26  ;;  %p2174_p9 = scmp.lt.s32.totalorder %s2165_s26, %s2165_s26 }
  0x4a   : > { %p2168_p2 = pnand %p2166_p0, %p2574_p8  ;;  %p2175_p4 = por %p2174_p9, %p2173_p7 }
  0x4c   : > { %p2169_p5 = pneg %p2168_p2 }
  0x4e   : > { %p2176_p10 = pnand %p2175_p4, %p2169_p5 }
  0x50   : > { %2179 = shalt.err (!%p2176_p10)
}
  0x51   : > { %2030 = dma.hbm_to_vmem [thread:$0]  (!%p2560_p6), %s3074_s5, 512, %s2564_s30, [#allocation12], %s3038_s14, %s3038_s14, %s3039_s15  }
  0x52   : > { %s1802_s12 = sadd.s32 4294967294, %s2436_s24   ;;  %s2626_s16 = sadd.s32 1, %s2436_s24  }
  0x53   : > { %3075 = sst [smem:[#allocation25_spill]] %s2626_s16  ;;  %s41_s17 = ssub.s32 %s2436_s24, %s2626_s16 }
  0x54   : > { %s44_s18 = sadd.s32 1, %s2432_s23  ;;  %p42_p11 = scmp.eq.s32.totalorder %s41_s17, 0 }
  0x55   : > { %p51_p12 = scmp.ne.s32.totalorder %s2432_s23, %s2428_s22  ;;  %p52_p13 = scmp.eq.s32.totalorder %s2436_s24, 0 }
  0x56   : > { %p57_p0 = scmp.ne.s32.totalorder %s2428_s22, %s2424_s21  ;;  %p301_p7 = scmp.eq.s32.totalorder %s2544_s27, 1 }
  0x57   : > { %s2637_s20 = scalar_select %p42_p11, %s2432_s23, %s44_s18  }
  0x58   : > { %p53_p2 = por %p52_p13, %p51_p12  ;;  %p2641_p5 = por %p3046_p1, %p57_p0 }
  0x59   : > { %3076 = sst [smem:[#allocation26_spill]] %s2637_s20  ;;  %p307_p9 = scmp.eq.s32.totalorder %s1802_s12, 1 }
  0x5a   : > { %s3077_s25 = scalar_select %p2641_p5, 1, 0 }
  0x5b   : > { %p2055_p4 = scmp.lt.s32.totalorder %s2436_s24, 2  ;;  %s3040_s30 = sand.u32 1, %s2432_s23  }
  0x5c   : > { %p2648_p10 = por %p301_p7, %p51_p12  ;;  %p2652_p3 = por %p307_p9, %p57_p0 }
  0x5d   : > { %s2658_s10 = sshll.u32 %s3040_s30, 3  ;;  %s2661_s11 = sshll.u32 %s2436_s24, 7 }
  0x5e   : > { %s3078_s29 = scalar_select %p2648_p10, 1, 0 }
  0x5f   : > { %s3080_s26 = scalar_select %p2652_p3, 1, 0 }
  0x60   : > { %3079 = sst [smem:[#allocation27_spill]] %s3078_s29  ;;  %p2663_p11 = pnand %p2055_p4, %p53_p2 }
  0x61   : > { %3081 = sst [smem:[#allocation28_spill]] %s3080_s26  ;;  %s433_s12 = sand.u32 1, %s2436_s24  }
  0x62   : > { %s3082_s17 = scalar_select %p2663_p11, 1, 0 }
  0x63   : > { %s3083_s1 = sld [smem:[#allocation29_spill]]  ;;  %s437_s30 = scalar_lea.vmem [#allocation5], %s2658_s10 }
  0x64   : > { %s444_s3 = sshll.u32 %s437_s30, 4  ;;  %s2442_s5 = smov [#allocation10]   ;;  %s2675_s3 = int_to_ptr.vmem [resolvable:$true] %s444_s3 }
  0x65   : > { %s2677_s20 = sshll.u32 %s2442_s5, 4  ;;  %s2679_s16 = scalar_lea.sflag [#allocation6], %s433_s12  ;;  %s366_s20 = int_to_ptr.vmem [resolvable:$true] %s2677_s20 }
  0x66   : > { %p2685_p13 = pneg %p2663_p11 }
  0x68   : > { %s3084_s14 = scalar_select %p2685_p13, 1, 0 }
  0x69   : > { %s2672_s15 = scalar_lea.hbm %s3083_s1, %s2661_s11  ;;  %s2185_s24 = scalar_lea.hbm %s3083_s1, 256 }
  0x6a   : > { %s2180_s26 = scalar_lea.hbm %s2672_s15, 128  ;;  %p2186_p7 = scmp.lt.u32.totalorder %s2672_s15, %s3083_s1 }
  0x6b   : > { %p2181_p12 = scmp.ne.s32.totalorder %s2672_s15, %s2180_s26  ;;  %p2187_p9 = scmp.lt.u32.totalorder %s2185_s24, %s2180_s26 }
  0x6c   : > { %p2189_p1 = scmp.lt.u32.totalorder %s2180_s26, %s2672_s15 }
  0x6d   : > { %p2183_p0 = pnand %p2685_p13, %p2181_p12  ;;  %p2188_p4 = por %p2187_p9, %p2186_p7 }
  0x6f   : > { %p2184_p2 = pneg %p2183_p0  ;;  %p2190_p3 = por %p2189_p1, %p2188_p4 }
  0x71   : > { %p2191_p10 = pnand %p2190_p3, %p2184_p2 }
  0x73   : > { %2194 = shalt.err (!%p2191_p10)
}
  0x74   : > { %s2195_s12 = scalar_lea.vmem %s2675_s3, 128  ;;  %s2443_s18 = smov [#allocation5]  }
  0x75   : > { %p2196_p12 = scmp.ne.s32.totalorder %s2675_s3, %s2195_s12  ;;  %s2200_s30 = sshll.u32 %s2443_s18, 4  ;;  %s2201_s30 = int_to_ptr.vmem [resolvable:$false] %s2200_s30 }
  0x76   : > { %s2202_s21 = scalar_lea.vmem %s2201_s30, 256  ;;  %p2203_p6 = scmp.lt.s32.totalorder %s2675_s3, %s2201_s30 }
  0x77   : > { %p2198_p0 = pnand %p2196_p12, %p2685_p13  ;;  %p2204_p8 = scmp.lt.s32.totalorder %s2202_s21, %s2195_s12 }
  0x79   : > { %p2199_p5 = pneg %p2198_p0  ;;  %p2205_p7 = por %p2204_p8, %p2203_p6 }
  0x7b   : > { %p2206_p9 = pnand %p2205_p7, %p2199_p5 }
  0x7d   : > { %2209 = shalt.err (!%p2206_p9)
}
  0x7e   : > { %2040 = dma.hbm_to_vmem [thread:$0]  (!%p2663_p11), %s2672_s15, 128, %s2675_s3, %s2679_s16  }
  0x7f   : > { %s2210_s5 = scalar_lea.hbm %s3026_s4, 512  ;;  %p3085_p3 = scmp.ne.s32.totalorder %s3073_s19, 0 }
  0x80   : > { %p2211_p1 = scmp.ne.s32.totalorder %s3026_s4, %s2210_s5  ;;  %p2217_p5 = scmp.lt.u32.totalorder %s2210_s5, %s3026_s4 }
  0x82   : > { %p2213_p6 = pnand %p2211_p1, %p3085_p3 }
  0x84   : > { %p2214_p8 = pneg %p2213_p6 }
  0x86   : > { %p2219_p10 = pnand %p2217_p5, %p2214_p8 }
  0x88   : > { %2222 = shalt.err (!%p2219_p10)
}
  0x89   : > { %s2223_s21 = scalar_lea.vmem %s366_s20, 512  ;;  %p2231_p0 = scmp.lt.s32.totalorder %s366_s20, %s366_s20 }
  0x8a   : > { %p2224_p2 = scmp.ne.s32.totalorder %s366_s20, %s2223_s21  ;;  %p2232_p7 = scmp.lt.s32.totalorder %s2223_s21, %s2223_s21 }
  0x8c   : > { %p2226_p4 = pnand %p2224_p2, %p3085_p3  ;;  %p2233_p9 = por %p2232_p7, %p2231_p0 }
  0x8e   : > { %p2227_p12 = pneg %p2226_p4 }
  0x90   : > { %p2234_p11 = pnand %p2233_p9, %p2227_p12 }
  0x92   : > { %2237 = shalt.err (!%p2234_p11)
}
  0x93   : > { %p3086_p1 = scmp.ne.s32.totalorder %s3071_s13, 0  ;;  %s3087_s1 = smov 8  }
  0x94   : > { %s3088_s3 = smov 128   ;;  %s2444_s26 = smov [#allocation13]  }
  0x95   : > { %2027 = dma.hbm_to_vmem [thread:$0]  (!%p3086_p1), %s3026_s4, 512, %s366_s20, [#allocation9], %s3088_s3, %s3088_s3, %s3087_s1  }
  0x96   : > { %s398_s5 = sshll.u32 %s2444_s26, 4  ;;  %s2238_s30 = scalar_lea.hbm %s3030_s8, 16  ;;  %s399_s5 = int_to_ptr.vmem [resolvable:$true] %s398_s5 }
  0x97   : > { %p2239_p11 = scmp.ne.s32.totalorder %s3030_s8, %s2238_s30  ;;  %p2245_p5 = scmp.lt.u32.totalorder %s2238_s30, %s3030_s8 }
  0x99   : > { %p2241_p6 = pnand %p2239_p11, %p3085_p3 }
  0x9b   : > { %p2242_p8 = pneg %p2241_p6 }
  0x9d   : > { %p2247_p10 = pnand %p2245_p5, %p2242_p8 }
  0x9f   : > { %2250 = shalt.err (!%p2247_p10)
}
  0xa0   : > { %s2251_s20 = scalar_lea.vmem %s399_s5, 16  ;;  %s2258_s1 = scalar_lea.vmem %s399_s5, 32 }
  0xa1   : > { %p2252_p2 = scmp.ne.s32.totalorder %s399_s5, %s2251_s20  ;;  %p2259_p0 = scmp.lt.s32.totalorder %s399_s5, %s399_s5 }
  0xa2   : > { %p2260_p7 = scmp.lt.s32.totalorder %s2258_s1, %s2251_s20 }
  0xa3   : > { %p2254_p4 = pnand %p2252_p2, %p3085_p3 }
  0xa4   : > { %p2261_p9 = por %p2260_p7, %p2259_p0 }
  0xa5   : > { %p2255_p12 = pneg %p2254_p4 }
  0xa7   : > { %p2262_p13 = pnand %p2261_p9, %p2255_p12 }
  0xa9   : > { %2265 = shalt.err (!%p2262_p13)
}
  0xaa   : > { %2033 = dma.hbm_to_vmem [thread:$0]  (!%p3086_p1), %s3030_s8, 16, %s399_s5, [#allocation12]  }
  0xab   : > { %s2753_s19 = scalar_lea.hbm %s3022_s0, %s2661_s11  ;;  %s419_s15 = scalar_lea.vmem [#allocation2], %s2658_s10 }
  0xac   : > { %s426_s24 = sshll.u32 %s419_s15, 4  ;;  %s3089_s13 = sand.u32 1, %s2432_s23   ;;  %s427_s24 = int_to_ptr.vmem [resolvable:$true] %s426_s24 }
  0xad   : > { %s416_s26 = scalar_lea.sflag [#allocation3], %s3089_s13  ;;  %s2266_s18 = scalar_lea.hbm %s2753_s19, 128 }
  0xae   : > { %p2267_p13 = scmp.ne.s32.totalorder %s2753_s19, %s2266_s18  ;;  %p3090_p3 = scmp.ne.s32.totalorder %s3084_s14, 0 }
  0xaf   : > { %s2271_s30 = scalar_lea.hbm %s3022_s0, 256  ;;  %p2272_p1 = scmp.lt.u32.totalorder %s2753_s19, %s3022_s0 }
  0xb0   : > { %p2269_p11 = pnand %p2267_p13, %p3090_p3  ;;  %p2273_p8 = scmp.lt.u32.totalorder %s2271_s30, %s2266_s18 }
  0xb1   : > { %p2275_p10 = scmp.lt.u32.totalorder %s2266_s18, %s2753_s19 }
  0xb2   : > { %p2270_p6 = pneg %p2269_p11  ;;  %p2274_p5 = por %p2273_p8, %p2272_p1 }
  0xb4   : > { %p2276_p2 = por %p2275_p10, %p2274_p5 }
  0xb6   : > { %p2277_p4 = pnand %p2276_p2, %p2270_p6 }
  0xb8   : > { %2280 = shalt.err (!%p2277_p4)
}
  0xb9   : > { %s2281_s1 = scalar_lea.vmem %s427_s24, 128  ;;  %s2445_s29 = smov [#allocation2]  }
  0xba   : > { %p2282_p12 = scmp.ne.s32.totalorder %s427_s24, %s2281_s1  ;;  %s2286_s3 = sshll.u32 %s2445_s29, 4  ;;  %s2287_s3 = int_to_ptr.vmem [resolvable:$false] %s2286_s3 }
  0xbb   : > { %s2288_s6 = scalar_lea.vmem %s2287_s3, 256  ;;  %p2289_p9 = scmp.lt.s32.totalorder %s427_s24, %s2287_s3 }
  0xbc   : > { %p2284_p0 = pnand %p2282_p12, %p3090_p3  ;;  %p2290_p13 = scmp.lt.s32.totalorder %s2288_s6, %s2281_s1 }
  0xbe   : > { %p2285_p7 = pneg %p2284_p0  ;;  %p2291_p11 = por %p2290_p13, %p2289_p9 }
  0xc0   : > { %p2292_p1 = pnand %p2291_p11, %p2285_p7 }
  0xc2   : > { %2295 = shalt.err (!%p2292_p1)
}
  0xc3   : > { %p3091_p8 = scmp.ne.s32.totalorder %s3082_s17, 0  ;;  %s2779_s13 = scalar_lea.hbm %s3024_s2, %s2661_s11 }
  0xc4   : > { %s455_s18 = scalar_lea.vmem [#allocation7], %s2658_s10  ;;  %s2296_s12 = scalar_lea.hbm %s2779_s13, 128 }
  0xc5   : > { %2037 = dma.hbm_to_vmem [thread:$0]  (!%p3091_p8), %s2753_s19, 128, %s427_s24, %s416_s26  }
  0xc6   : > { %s462_s5 = sshll.u32 %s455_s18, 4  ;;  %p2297_p6 = scmp.ne.s32.totalorder %s2779_s13, %s2296_s12  ;;  %s463_s5 = int_to_ptr.vmem [resolvable:$true] %s462_s5 }
  0xc7   : > { %s2301_s19 = scalar_lea.hbm %s3024_s2, 256  ;;  %p2302_p2 = scmp.lt.u32.totalorder %s2779_s13, %s3024_s2 }
  0xc8   : > { %p2299_p5 = pnand %p2297_p6, %p3090_p3  ;;  %p2303_p4 = scmp.lt.u32.totalorder %s2301_s19, %s2296_s12 }
  0xc9   : > { %p2305_p0 = scmp.lt.u32.totalorder %s2296_s12, %s2779_s13 }
  0xca   : > { %p2300_p10 = pneg %p2299_p5  ;;  %p2304_p12 = por %p2303_p4, %p2302_p2 }
  0xcc   : > { %p2306_p7 = por %p2305_p0, %p2304_p12 }
  0xce   : > { %p2307_p9 = pnand %p2306_p7, %p2300_p10 }
  0xd0   : > { %2310 = shalt.err (!%p2307_p9)
}
  0xd1   : > { %s2311_s10 = scalar_lea.vmem %s463_s5, 128  ;;  %s2446_s11 = smov [#allocation7]  }
  0xd2   : > { %p2312_p13 = scmp.ne.s32.totalorder %s463_s5, %s2311_s10  ;;  %s2316_s20 = sshll.u32 %s2446_s11, 4  ;;  %s2317_s20 = int_to_ptr.vmem [resolvable:$false] %s2316_s20 }
  0xd3   : > { %s2318_s1 = scalar_lea.vmem %s2317_s20, 256  ;;  %p2319_p6 = scmp.lt.s32.totalorder %s463_s5, %s2317_s20 }
  0xd4   : > { %p2314_p11 = pnand %p2312_p13, %p3090_p3  ;;  %p2320_p5 = scmp.lt.s32.totalorder %s2318_s1, %s2311_s10 }
  0xd6   : > { %p2315_p1 = pneg %p2314_p11  ;;  %p2321_p8 = por %p2320_p5, %p2319_p6 }
  0xd8   : > { %p2322_p2 = pnand %p2321_p8, %p2315_p1 }
  0xda   : > { %2325 = shalt.err (!%p2322_p2)
}
  0xdb   : > { %p3092_p4 = scmp.ne.s32.totalorder %s3082_s17, 0  ;;  %p3093_p10 = scmp.ne.s32.totalorder %s3070_s28, 0 }
  0xdc   : > { %s2803_s14 = sand.u32 (!%p3093_p10), 1, %s2428_s22   ;;  %p3094_p3 = scmp.ne.s32.totalorder (!%p3093_p10), %s3077_s25, 0 }
  0xdd   : > { %2043 = dma.hbm_to_vmem [thread:$0]  (!%p3092_p4), %s2779_s13, 128, %s463_s5, %s2679_s16  }
  0xde   : > { %471 = sbr.rel (%p3093_p10) target bundleno = 2143 (0x85f), region = 64  ;;  %s2806_s29 = sshll.u32 (!%p3093_p10), %s2803_s14, 3 }
  0xdf   : > { %s474_s3 = scalar_lea.sflag (!%p3093_p10), [#allocation3], %s2803_s14  ;;  %s477_s6 = scalar_lea.vmem (!%p3093_p10), [#allocation2], %s2806_s29 }
  0xe5   : > { %2399 = dma.done.wait (%p3094_p3), %s474_s3, 128  }
  0xe6   : > { %2401 = vsyncadd (%p3094_p3), %s474_s3, 4294967168  ;;  %s482_s28 = sand.u32 1, %s2544_s27   ;;  %s486_s17 = scalar_lea.vmem [#allocation5], %s2806_s29 }
  0xe7   : > { %s483_s16 = scalar_lea.sflag [#allocation6], %s482_s28 }
  0xe8   : > { %2403 = dma.done.wait (%p3094_p3), %s483_s16, 256  }
  0xe9   : > { %2405 = vsyncadd (%p3094_p3), %s483_s16, 4294967040  ;;  %s495_s9 = scalar_lea.vmem [#allocation7], %s2806_s29  ;;  %p3095_p8 = scmp.eq.s32.totalorder %s2544_s27, 0 }
  0xeb   : > { %2407 = dma.done.wait (%p3095_p8), [#allocation9], 1024   ;;  %p3096_p12 = pmov %p3095_p8 }
  0xec   : > { %p3097_p0 = pmov %p3095_p8 }
  0xed   : > { %2409 = vsyncadd (%p3096_p12), [#allocation9], 4294966272 }
  0xee   : > { %2411 = dma.done.wait (%p3097_p0), [#allocation12], 528   ;;  %p3098_p7 = pmov %p3097_p0 }
  0xef   : > { %v2447_v0 = vmov 0.0|0.0   ;;  %vm2448_vm0 = vmmov 0   ;;  %v2449_v1 = vmov 0.0   ;;  %v574_v2 = vld [vmem:[#allocation10] sm:$0xff]  ;;  %v575_v3 = vld [vmem:[#allocation10 + $0x8] sm:$0xff]  ;;  %v576_v7 = vld [vmem:[#allocation10 + $0x10] sm:$0xff] }
  0xf0   : > { %2413 = vsyncadd (%p3098_p7), [#allocation12], 4294966768  ;;  %1977 = vmatprep.subr.bf16.mxu1 %v2447_v0  ;;  %1971 = vmatprep.subr.bf16.mxu0 %v2447_v0  ;;  %v570_v4 = vld [vmem:[#allocation8] sm:$0xff]  ;;  %v1978_v5 = vpack.c.bf16 %v575_v3, %v574_v2  ;;  %v571_v6 = vld [vmem:[#allocation8 + $0x8] sm:$0xff]  ;;  %vm596_vm1 = vcmask 261120   ;;  %s3099_s5 = sld [smem:[#allocation32_spill]] }
  0xf1   : > { %1906 = vmatprep.mubr.msk.f32.mxu1 %vm2448_vm0, %v2449_v1  ;;  %1895 = vmatprep.mubr.msk.f32.mxu0 %vm2448_vm0, %v2449_v1  ;;  %v577_v8 = vld [vmem:[#allocation10 + $0x18] sm:$0xff]  ;;  %v1972_v9 = vpack.c.bf16 %v571_v6, %v570_v4  ;;  %v572_v10 = vld [vmem:[#allocation8 + $0x10] sm:$0xff]  ;;  %v568_v14 = vld [vmem:[%s486_s17] sm:$0xff]  ;;  %vm828_vm2 = vcmask 64512   ;;  %s2450_s12 = smov 120   ;;  %s2451_s30 = smov 112  }
  0xf2   : > { %v573_v11 = vld [vmem:[#allocation8 + $0x18] sm:$0xff]  ;;  %1979 = vmatpush3.bf16.msra.mxu1 %v1978_v5  ;;  %v1981_v12 = vpack.c.bf16 %v577_v8, %v576_v7  ;;  %v1827_v16 = vld [vmem:[%s3029_s7] ss:$0 sm:$0xff]  ;;  %s2452_s21 = smov 104   ;;  %v578_v24 = vld [vmem:[#allocation11] sm:$0xff]  ;;  %s566_s19 = scalar_lea.vmem [#allocation15], %s2806_s29 }
  0xf3   : > { %1973 = vmatpush3.bf16.msra.mxu0 %v1972_v9  ;;  %1980 = vmatprep.subr.bf16.mxu1 %v2447_v0  ;;  %v1975_v13 = vpack.c.bf16 %v573_v11, %v572_v10  ;;  %v567_v15 = vld [vmem:[%s477_s6] sm:$0xff]  ;;  %v579_v25 = vld [vmem:[#allocation11 + $0x8] sm:$0xff]  ;;  %v1829_v39 = vld [vmem:[#allocation13] ss:$0 sm:$0xff]  ;;  %s3100_s10 = sld [smem:[#allocation33_spill]]  ;;  %s2453_s16 = smov 8  }
  0xf4   : > { %1974 = vmatprep.subr.bf16.mxu0 %v2447_v0  ;;  %v580_v26 = vld [vmem:[#allocation11 + $0x10] sm:$0xff]  ;;  %v1984_v27 = vpack.c.bf16 %v579_v25, %v578_v24  ;;  %v581_v28 = vld [vmem:[#allocation11 + $0x18] sm:$0xff]  ;;  %s2454_s17 = smov 16   ;;  %s3101_s25 = sld [smem:[#allocation27_spill]]  ;;  %vm1501_vm3 = vcmask 130048   ;;  %vm1503_vm4 = vcmask 195584  }
  0xf5   : > { %v1987_v29 = vpack.c.bf16 %v581_v28, %v580_v26  ;;  %v569_v30 = vld [vmem:[%s495_s9] sm:$0xff]  ;;  %s2455_s9 = smov 24   ;;  %s1847_s15 = sshll.u32 %s2544_s27, 7 }
  0xf6   : > { %1982 = vmatpush3.bf16.msra.mxu1 %v1981_v12  ;;  %v1825_v17 = vld [vmem:[%s3099_s5] ss:$0 sm:$0xff]  ;;  %s3102_s5 = sld [smem:[#allocation36_spill]]  ;;  %s2456_s26 = smov [#allocation15]  }
  0xf7   : > { %1976 = vmatpush3.bf16.msra.mxu0 %v1975_v13  ;;  %1920 = vmatprep.subr.mxu1 %v2449_v1  ;;  %s2330_s11 = sshll.u32 %s2456_s26, 4  ;;  %s2331_s11 = int_to_ptr.vmem [resolvable:$false] %s2330_s11 }
  0xf8   : > { %1983 = vmatprep.subr.bf16.mxu0 %v2447_v0  ;;  %s2332_s20 = scalar_lea.vmem %s2331_s11, 256 }
  0xf9   : > { %1907 = vmatmul.mubr.msk.f32.vlgmr.msra.gmra.mrb[0].mxu1 %vm596_vm1, %v568_v14 }
  0xfa   : > { %1896 = vmatmul.mubr.msk.f32.vlgmr.msra.gmra.mrb[0].mxu0 %vm596_vm1, %v567_v15  ;;  %1922 = vmatprep.mubr.msk.f32.mxu1 %vm2448_vm0, %v2449_v1  ;;  %p3103_p13 = scmp.ne.s32.totalorder %s3101_s25, 0 }
  0xfb   : > { %1917 = vmatprep.mubr.msk.f32.mxu0 %vm2448_vm0, %v2449_v1  ;;  %1985 = vmatpush3.bf16.msra.mxu0 %v1984_v27 }
  0xfc   : > { %1986 = vmatprep.subr.bf16.mxu0 %v2447_v0 }
  0xff   : > { %1988 = vmatpush3.bf16.msra.mxu0 %v1987_v29 }
 0x100   : > { %1940 = vmatprep.subr.mxu0 %v2449_v1 }
 0x102   : > { %1918 = vmatmul.mubr.msk.f32.vlgmr.msra.gmra.mrb[2].mxu0 %vm596_vm1, %v569_v30 }
 0x103   : > { %1942 = vmatprep.mubr.msk.f32.mxu0 %vm2448_vm0, %v2449_v1 }
 0x1cc   : > { %v745_v18 = vpop.f32.mrb[0].mxu1 }
 0x1cd   : > { %v746_v19 = vadd.f32 %v1827_v16, %v745_v18  ;;  %v1908_v20 = vpop.f32.mrb[1].mxu1  ;;  %v666_v21 = vpop.f32.mrb[0].mxu0 }
 0x1ce   : > { %v667_v22 = vadd.f32 %v1825_v17, %v666_v21  ;;  %v1897_v23 = vpop.f32.mrb[1].mxu0 }
 0x1cf   : > { %991 = vrot.lane.b32.xlu1 %v746_v19, %s2450_s12  ;;  %1921 = vmatpush3.xpose.msk.msra.mxu1 %vm828_vm2, %v746_v19 }
 0x1d0   : > { %1925 = vmatprep.subr.mxu1 %v2449_v1 }
 0x1d2   : > { %1923 = vmatmul.mubr.msk.f32.vlgmr.msra.gmra.mrb[2].mxu1 %vm828_vm2, %v667_v22 }
 0x1d3   : > { %989 = vrot.lane.b32.xlu1 %v667_v22, %s2450_s12  ;;  %1927 = vmatprep.mubr.msk.f32.mxu1 %vm2448_vm0, %v2449_v1 }
 0x1d5   : > { %v824_v40 = vpop.f32.mrb[2].mxu0 }
 0x1d6   : > { %v2874_v41 = vadd.f32 %v1829_v39, %v824_v40  ;;  %v1919_v42 = vpop.f32.mrb[3].mxu0 }
 0x1d7   : > { %1156 = vrot.lane.b32.xlu1 %v667_v22, %s2451_s30 }
 0x1d8   : > { %1926 = vmatpush3.msra.mxu1 %v2874_v41 }
 0x1d9   : > { %1930 = vmatprep.subr.mxu1 %v2449_v1 }
 0x1db   : > { %1324 = vrot.lane.b32.xlu1 %v746_v19, %s2452_s21 }
 0x1df   : > { %1322 = vrot.lane.b32.xlu1 %v667_v22, %s2452_s21 }
 0x241   : > { %v992_v43 = vpop.permute.xlu1 %991 }
 0x245   : > { %v990_v44 = vpop.permute.xlu1 %989 }
 0x249   : > { %v1157_v45 = vpop.permute.xlu1 %1156 }
 0x24d   : > { %v1325_v48 = vpop.permute.xlu1 %1324 }
 0x251   : > { %v1323_v50 = vpop.permute.xlu1 %1322 }
 0x2a5   : > { %v901_v31 = vpop.f32.mrb[2].mxu1 }
 0x2a6   : > { %v1924_v32 = vpop.f32.mrb[3].mxu1  ;;  %v905_v33 = vsel %vm828_vm2, %v901_v31, -inf }
 0x2a7   : > { %906 = vmax.xlane.f32.xlu0 %v905_v33  ;;  %v585_v32 = vld [vmem:[%s3100_s10] sm:$0xff]  ;;  %v586_v33 = vld [vmem:[%s3100_s10 + $0x8] sm:$0xff] }
 0x334   : > { %v907_v34 = vpop.xlane.xlu0 %906 }
 0x335   : > { %v908_v35 = vsub.f32 %v901_v31, %v907_v34  ;;  %v1990_v34 = vpack.c.bf16 %v586_v33, %v585_v32 }
 0x337   : > { %v909_v36 = vmul.f32 1.442695, %v908_v35  ;;  %v588_v35 = vld [vmem:[%s3100_s10 + $0x18] sm:$0xff] }
 0x339   : > { %2108 = vpow2.f32 %v909_v36 }
 0x343   : > { %v2109_v37 = vpop.eup %2108 }
 0x344   : > { %v911_v38 = vsel %vm828_vm2, %v2109_v37, 0.0 }
 0x345   : > { %912 = vadd.xlane.f32.xlu0 %v911_v38 }
 0x35b   : > { %1158 = vrot.lane.b32.xlu0 %v746_v19, %s2451_s30 }
 0x3d2   : > { %v913_v46 = vpop.xlane.xlu0 %912 }
 0x3d3   : > { %2110 = vrcp.f32 %v913_v46 }
 0x3d6   : > { %v1159_v47 = vpop.permute.xlu0 %1158 }
 0x3d7   : > { %1941 = vmatpush3.xpose.msk.msra.mxu0 %vm828_vm2, %v1159_v47 }
 0x3d8   : > { %1950 = vmatprep.subr.mxu0 %v2449_v1 }
 0x3da   : > { %1943 = vmatmul.mubr.msk.f32.vlgmr.msra.gmra.mrb[4].mxu0 %vm828_vm2, %v1157_v45 }
 0x3db   : > { %1951 = vmatpush3.xpose.msk.msra.mxu0 %vm828_vm2, %v1325_v48  ;;  %1952 = vmatprep.mubr.msk.f32.mxu0 %vm2448_vm0, %v2449_v1 }
 0x3dc   : > { %1989 = vmatprep.subr.bf16.mxu0 %v2447_v0 }
 0x3dd   : > { %v2111_v49 = vpop.eup %2110 }
 0x3de   : > { %v915_v51 = vmul.f32 %v2111_v49, %v2109_v37  ;;  %1953 = vmatmul.mubr.msk.f32.vlgmr.msra.gmra.mrb[6].mxu0 %vm828_vm2, %v1323_v50 }
 0x3df   : > { %1968 = vmatprep.mubr.msk.f32.mxu0 %vm2448_vm0, %v2449_v1  ;;  %1991 = vmatpush3.bf16.msra.mxu0 %v1990_v34 }
 0x3e0   : > { %1928 = vmatmul.mubr.msk.f32.vlgmr.msra.gmra.mrb[4].mxu1 %vm828_vm2, %v915_v51  ;;  %1992 = vmatprep.subr.bf16.mxu0 %v2447_v0 }
 0x3e1   : > { %1931 = vmatpush3.xpose.msk.msra.mxu1 %vm828_vm2, %v992_v43  ;;  %1932 = vmatprep.mubr.msk.f32.mxu1 %vm2448_vm0, %v2449_v1 }
 0x3e2   : > { %1935 = vmatprep.subr.mxu1 %v2449_v1 }
 0x3e4   : > { %1933 = vmatmul.mubr.msk.f32.vlgmr.msra.gmra.mrb[6].mxu1 %vm828_vm2, %v990_v44 }
 0x3e5   : > { %1937 = vmatprep.mubr.msk.f32.mxu1 %vm2448_vm0, %v2449_v1 }
 0x4ad   : > { %v1230_v52 = vpop.f32.mrb[4].mxu0 }
 0x4ae   : > { %v1944_v53 = vpop.f32.mrb[5].mxu0  ;;  %v1234_v54 = vsel %vm828_vm2, %v1230_v52, -inf }
 0x4af   : > { %1235 = vmax.xlane.f32.xlu0 %v1234_v54 }
 0x4b1   : > { %v1396_v55 = vpop.f32.mrb[6].mxu0 }
 0x4b2   : > { %v1954_v56 = vpop.f32.mrb[7].mxu0  ;;  %v1400_v62 = vsel %vm828_vm2, %v1396_v55, -inf }
 0x4b3   : > { %v2898_v57 = vpop.f32.mrb[4].mxu1 }
 0x4b4   : > { %v1929_v58 = vpop.f32.mrb[5].mxu1 }
 0x4b7   : > { %v1063_v59 = vpop.f32.mrb[6].mxu1 }
 0x4b8   : > { %v1934_v60 = vpop.f32.mrb[7].mxu1  ;;  %v1067_v61 = vsel %vm828_vm2, %v1063_v59, -inf }
 0x4b9   : > { %1068 = vmax.xlane.f32.xlu1 %v1067_v61 }
 0x4bd   : > { %1401 = vmax.xlane.f32.xlu1 %v1400_v62 }
 0x53c   : > { %v1236_v63 = vpop.xlane.xlu0 %1235 }
 0x53d   : > { %v1237_v2 = vsub.f32 %v1230_v52, %v1236_v63 }
 0x53f   : > { %v1238_v3 = vmul.f32 1.442695, %v1237_v2 }
 0x541   : > { %2112 = vpow2.f32 %v1238_v3 }
 0x546   : > { %v1069_v4 = vpop.xlane.xlu1 %1068 }
 0x547   : > { %v1070_v12 = vsub.f32 %v1063_v59, %v1069_v4 }
 0x549   : > { %v1071_v13 = vmul.f32 1.442695, %v1070_v12 }
 0x54a   : > { %v1402_v5 = vpop.xlane.xlu1 %1401 }
 0x54b   : > { %v2113_v6 = vpop.eup %2112  ;;  %v1403_v7 = vsub.f32 %v1396_v55, %v1402_v5 }
 0x54c   : > { %v1240_v8 = vsel %vm828_vm2, %v2113_v6, 0.0 }
 0x54d   : > { %v1404_v9 = vmul.f32 1.442695, %v1403_v7  ;;  %1241 = vadd.xlane.f32.xlu0 %v1240_v8 }
 0x54f   : > { %2114 = vpow2.f32 %v1404_v9 }
 0x550   : > { %2116 = vpow2.f32 %v1071_v13 }
 0x559   : > { %v2115_v10 = vpop.eup %2114 }
 0x55a   : > { %v1406_v11 = vsel %vm828_vm2, %v2115_v10, 0.0  ;;  %v2117_v14 = vpop.eup %2116 }
 0x55b   : > { %1407 = vadd.xlane.f32.xlu1 %v1406_v11  ;;  %v1073_v15 = vsel %vm828_vm2, %v2117_v14, 0.0 }
 0x563   : > { %1079 = vrot.lane.b32.xlu0 %v2874_v41, %s2450_s12  ;;  %s2946_s12 = scalar_lea.hbm %s3102_s5, %s1847_s15 }
 0x56c   : > { %1245 = vrot.lane.b32.xlu1 %v2874_v41, %s2451_s30  ;;  %s1619_s30 = sshll.u32 %s566_s19, 4  ;;  %s1620_s30 = int_to_ptr.vmem [resolvable:$true] %s1619_s30 }
 0x56d   : > { %s2326_s24 = scalar_lea.vmem %s1620_s30, 128  ;;  %p2333_p6 = scmp.lt.s32.totalorder %s1620_s30, %s2331_s11 }
 0x56e   : > { %p2327_p9 = scmp.ne.s32.totalorder %s1620_s30, %s2326_s24  ;;  %p2334_p5 = scmp.lt.s32.totalorder %s2332_s20, %s2326_s24 }
 0x570   : > { %p2328_p11 = pnand %p2327_p9, %p3103_p13  ;;  %p2335_p2 = por %p2334_p5, %p2333_p6 }
 0x572   : > { %p2329_p1 = pneg %p2328_p11 }
 0x574   : > { %p2336_p4 = pnand %p2335_p2, %p2329_p1 }
 0x590   : > { %1074 = vadd.xlane.f32.xlu1 %v1073_v15 }
 0x5a1   : > { %1411 = vrot.lane.b32.xlu1 %v2874_v41, %s2452_s21  ;;  %s1593_s21 = scalar_lea.sflag [#allocation16], %s2803_s14 }
 0x5da   : > { %v1242_v16 = vpop.xlane.xlu0 %1241 }
 0x5db   : > { %2118 = vrcp.f32 %v1242_v16 }
 0x5de   : > { %v1080_v17 = vpop.permute.xlu0 %1079 }
 0x5df   : > { %1936 = vmatpush3.msra.mxu1 %v1080_v17 }
 0x5e0   : > { %1945 = vmatprep.subr.mxu1 %v2449_v1 }
 0x5e5   : > { %v2119_v21 = vpop.eup %2118 }
 0x5e6   : > { %v1244_v25 = vmul.f32 %v2119_v21, %v2113_v6 }
 0x5e8   : > { %v1408_v18 = vpop.xlane.xlu1 %1407 }
 0x5ec   : > { %v1246_v19 = vpop.permute.xlu1 %1245 }
 0x61d   : > { %v1075_v20 = vpop.xlane.xlu1 %1074 }
 0x61e   : > { %2120 = vrcp.f32 %v1075_v20 }
 0x61f   : > { %2122 = vrcp.f32 %v1408_v18 }
 0x621   : > { %v1412_v29 = vpop.permute.xlu1 %1411 }
 0x628   : > { %v2121_v22 = vpop.eup %2120 }
 0x629   : > { %v1077_v23 = vmul.f32 %v2121_v22, %v2117_v14  ;;  %v2123_v24 = vpop.eup %2122 }
 0x62a   : > { %v1410_v27 = vmul.f32 %v2123_v24, %v2115_v10 }
 0x62b   : > { %v1155_v26 = vadd.f32 %v1077_v23, %v915_v51  ;;  %1938 = vmatmul.mubr.msk.f32.vlgmr.msra.gmra.mrb[8].mxu1 %vm828_vm2, %v1077_v23 }
 0x62c   : > { %1946 = vmatpush3.msra.mxu1 %v1246_v19  ;;  %1947 = vmatprep.mubr.msk.f32.mxu1 %vm2448_vm0, %v2449_v1 }
 0x62d   : > { %v1321_v28 = vadd.f32 %v1244_v25, %v1155_v26  ;;  %1955 = vmatprep.subr.mxu1 %v2449_v1 }
 0x62f   : > { %1948 = vmatmul.mubr.msk.f32.vlgmr.msra.gmra.mrb[10].mxu1 %vm828_vm2, %v1244_v25  ;;  %v1487_v30 = vadd.f32 %v1410_v27, %v1321_v28 }
 0x630   : > { %1956 = vmatpush3.msra.mxu1 %v1412_v29  ;;  %1957 = vmatprep.mubr.msk.f32.mxu1 %vm2448_vm0, %v2449_v1  ;;  %v587_v1 = vld [vmem:[%s3100_s10 + $0x10] sm:$0xff] }
 0x631   : > { %v1584_v31 = vmul.f32 0.25, %v1487_v30  ;;  %v1993_v36 = vpack.c.bf16 %v588_v35, %v587_v1 }
 0x633   : > { %1958 = vmatmul.mubr.msk.f32.vlgmr.msra.gmra.mrb[12].mxu1 %vm828_vm2, %v1410_v27  ;;  %1586 = vst.msk [vmem:[%s566_s19] sm:$0xff] %vm828_vm2, %v1584_v31  ;;  %1994 = vmatpush3.bf16.msra.mxu0 %v1993_v36 }
 0x6fe   : > { %v1151_v37 = vpop.f32.mrb[8].mxu1 }
 0x6ff   : > { %1489 = vrot.lane.b32.xlu0 %v1151_v37, %s2453_s16  ;;  %v1939_v38 = vpop.f32.mrb[9].mxu1 }
 0x702   : > { %v1317_v39 = vpop.f32.mrb[10].mxu1 }
 0x703   : > { %1493 = vrot.lane.b32.xlu1 %v1317_v39, %s2454_s17  ;;  %v1949_v0 = vpop.f32.mrb[11].mxu1 }
 0x706   : > { %v1483_v40 = vpop.f32.mrb[12].mxu1 }
 0x707   : > { %1497 = vrot.lane.b32.xlu0 %v1483_v40, %s2455_s9  ;;  %v1959_v41 = vpop.f32.mrb[13].mxu1 }
 0x771   : > { %v1490_v42 = vpop.permute.xlu0 %1489 }
 0x772   : > { %v1500_v44 = vsel %vm828_vm2, %v2898_v57, %v1490_v42 }
 0x775   : > { %v1494_v43 = vpop.permute.xlu1 %1493 }
 0x776   : > { %v1502_v45 = vsel %vm1501_vm3, %v1500_v44, %v1494_v43 }
 0x779   : > { %v1498_v46 = vpop.permute.xlu0 %1497 }
 0x77a   : > { %v1504_v47 = vsel %vm1503_vm4, %v1502_v45, %v1498_v46 }
 0x77b   : > { %1969 = vmatmul.mubr.msk.f32.vlgmr.msra.gmra.mrb[8].mxu0 %vm596_vm1, %v1504_v47 }
 0x77c   : > { %2339 = shalt.err (!%p2336_p4)
}
 0x77d   : > { %s2340_s19 = scalar_lea.hbm %s2946_s12, 128  ;;  %s2344_s6 = scalar_lea.hbm %s3102_s5, 256 }
 0x77e   : > { %p2341_p10 = scmp.ne.s32.totalorder %s2946_s12, %s2340_s19  ;;  %p2345_p12 = scmp.lt.u32.totalorder %s2946_s12, %s3102_s5 }
 0x77f   : > { %p2346_p0 = scmp.lt.u32.totalorder %s2344_s6, %s2340_s19  ;;  %p2348_p9 = scmp.lt.u32.totalorder %s2340_s19, %s2946_s12 }
 0x780   : > { %p2342_p3 = pnand %p2341_p10, %p3103_p13 }
 0x781   : > { %p2347_p7 = por %p2346_p0, %p2345_p12 }
 0x782   : > { %p2343_p8 = pneg %p2342_p3 }
 0x783   : > { %p2349_p11 = por %p2348_p9, %p2347_p7 }
 0x785   : > { %p2350_p1 = pnand %p2349_p11, %p2343_p8 }
 0x787   : > { %2353 = shalt.err (!%p2350_p1)
}
 0x788   : > { %2018 = dma.vmem_to_hbm [thread:$0]  (%p3103_p13), %s1620_s30, 128, %s2946_s12, %s1593_s21  }
 0x789   : > { %s3104_s13 = sld [smem:[#allocation34_spill]]  ;;  %s559_s18 = scalar_lea.vmem [#allocation14], %s2806_s29 }
 0x78a   : > { %s1606_s24 = sshll.u32 %s559_s18, 4  ;;  %s3105_s20 = sld [smem:[#allocation35_spill]]  ;;  %s2979_s24 = int_to_ptr.vmem [resolvable:$true] %s1606_s24 }
 0x78b   : > { %s1588_s12 = scalar_lea.sflag [#allocation4], %s2803_s14  ;;  %s2354_s30 = scalar_lea.vmem %s2979_s24, 128 }
 0x78c   : > { %p2355_p6 = scmp.ne.s32.totalorder %s2979_s24, %s2354_s30  ;;  %s2457_s29 = smov [#allocation14]  }
 0x78d   : > { %s2358_s27 = sshll.u32 %s2457_s29, 4  ;;  %s2359_s27 = int_to_ptr.vmem [resolvable:$false] %s2358_s27 }
 0x78e   : > { %p2356_p5 = pnand %p2355_p6, %p3103_p13  ;;  %s2360_s21 = scalar_lea.vmem %s2359_s27, 256 }
 0x78f   : > { %v1843_v48 = vld [vmem:[%s3104_s13] ss:$0 sm:$0xff]  ;;  %p2361_p4 = scmp.lt.s32.totalorder %s2979_s24, %s2359_s27  ;;  %p2362_p10 = scmp.lt.s32.totalorder %s2360_s21, %s2354_s30 }
 0x790   : > { %s2977_s19 = scalar_lea.hbm %s3105_s20, %s1847_s15  ;;  %p2357_p2 = pneg %p2356_p5 }
 0x791   : > { %p2363_p3 = por %p2362_p10, %p2361_p4 }
 0x793   : > { %p2364_p8 = pnand %p2363_p3, %p2357_p2 }
 0x84e   : > { %v1580_v49 = vpop.f32.mrb[8].mxu0 }
 0x84f   : > { %v1581_v50 = vadd.f32 %v1843_v48, %v1580_v49  ;;  %v1970_v51 = vpop.f32.mrb[9].mxu0 }
 0x851   : > { %1585 = vst.msk [vmem:[%s559_s18] sm:$0xff] %vm596_vm1, %v1581_v50 }
 0x852   : > { %2367 = shalt.err (!%p2364_p8)
}
 0x853   : > { %s2368_s14 = scalar_lea.hbm %s2977_s19, 128  ;;  %s2372_s3 = scalar_lea.hbm %s3105_s20, 256 }
 0x854   : > { %p2369_p12 = scmp.ne.s32.totalorder %s2977_s19, %s2368_s14  ;;  %p2373_p9 = scmp.lt.u32.totalorder %s2977_s19, %s3105_s20 }
 0x855   : > { %p2374_p11 = scmp.lt.u32.totalorder %s2372_s3, %s2368_s14  ;;  %p2376_p6 = scmp.lt.u32.totalorder %s2368_s14, %s2977_s19 }
 0x856   : > { %p2370_p0 = pnand %p2369_p12, %p3103_p13 }
 0x857   : > { %p2375_p1 = por %p2374_p11, %p2373_p9 }
 0x858   : > { %p2371_p7 = pneg %p2370_p0 }
 0x859   : > { %p2377_p5 = por %p2376_p6, %p2375_p1 }
 0x85b   : > { %p2378_p2 = pnand %p2377_p5, %p2371_p7 }
 0x85d   : > { %2381 = shalt.err (!%p2378_p2)
}
 0x85e   : > { %2017 = dma.vmem_to_hbm [thread:$0]  (%p3103_p13), %s2979_s24, 128, %s2977_s19, %s1588_s12  }
 0x85f PF: > { %s3106_s16 = sld [smem:[#allocation23_spill]]  ;;  %s3107_s17 = sld [smem:[#allocation28_spill]] }
 0x860   : > { %s3108_s9 = sld [smem:[#allocation24_spill]] }
 0x865   : > { %s1631_s13 = sand.u32 1, %s3106_s16   ;;  %p3109_p4 = scmp.ne.s32.totalorder %s3107_s17, 0 }
 0x866   : > { %p3110_p10 = scmp.ge.s32.totalorder %s3108_s9, 2  ;;  %s1632_s18 = scalar_lea.sflag [#allocation4], %s1631_s13 }
 0x868   : > { %p2045_p3 = pnand %p3110_p10, %p3109_p4 }
 0x86a   : > { %2415 = dma.done.wait (!%p2045_p3), %s1632_s18, 128  }
 0x86b   : > { %2417 = vsyncadd (!%p2045_p3), %s1632_s18, 4294967168  ;;  %s1641_s26 = scalar_lea.sflag [#allocation16], %s1631_s13 }
 0x86c   : > { %2419 = dma.done.wait (!%p2045_p3), %s1641_s26, 128  }
 0x86d   : > { %2421 = vsyncadd (!%p2045_p3), %s1641_s26, 4294967168  ;;  %s3111_s24 = sld [smem:[#allocation25_spill]]  ;;  %s3112_s25 = sld [smem:[#allocation26_spill]] }
 0x86e   : > { %s3113_s21 = smov %s2428_s22  ;;  %s3114_s22 = smov %s2432_s23 }
 0x873   : > { %p34_p13 = scmp.ge.s32.totalorder %s3111_s24, 4   ;;  %s3115_s23 = smov %s3112_s25 }
 0x875   :  { %36 = sbr.rel (!%p34_p13) target bundleno = 20 (0x14), region = 166 }
 0x87c   :  { %1646 = vsyncpa [#allocation3], 1 }
 0x87d   :  { %1648 = vsyncpa [#allocation3 + $0x1], 1 }
 0x87e   :  { %1649 = vsyncpa [#allocation6], 1 }
 0x87f   :  { %1651 = vsyncpa [#allocation6 + $0x1], 1 }
 0x880   :  { %1652 = vsyncpa [#allocation9], 1 }
 0x881   :  { %1653 = vsyncpa [#allocation12], 1 }
 0x882   :  { %1654 = vsyncpa [#allocation4], 1 }
 0x883   :  { %1656 = vsyncpa [#allocation4 + $0x1], 1 }
 0x884   :  { %1657 = vsyncpa [#allocation16], 1 }
 0x885   :  { %1659 = vsyncpa [#allocation16 + $0x1], 1 }

</bundles_post_ra>
